<compile_context>
chip_gen: v5e
topology: v5e:2x2
jax: 0.10.0
libtpu: 0.0.40
codegen_flags: <defaults>
</compile_context>

<pallas_src>
import functools

import jax
import jax.numpy as jnp
from jax import lax
from jax.experimental import pallas as pl
from jax.experimental.pallas import tpu as pltpu

LEAKY_SLOPE = 0.01   # nn.LeakyReLU default negative_slope
OUT_PAD = 128        # lane-dense output slab; real outputs live in cols [0, 6)


# ---------------------------------------------------------------------------
# Hardware-aware sizing helpers
# ---------------------------------------------------------------------------
def _vmem_plan():
    """Return (per-block spatial tile budget, vmem_limit_bytes)."""
    cap = 64 * 1024 * 1024
    try:
        cap = int(getattr(pltpu.get_tpu_info(), "vmem_capacity_bytes", cap))
    except Exception:
        pass
    if cap <= 64 * 1024 * 1024:                       # v7x-class: 64 MiB VMEM, ~3.2 TB/s
        return 14 * 1024 * 1024, 44 * 1024 * 1024
    return 8 * 1024 * 1024, 40 * 1024 * 1024          # v5e/v6e-class: 128 MiB VMEM


def _detect_num_tensorcores():
    """Best-effort TC-per-chip query; defaults to 1 (safe everywhere)."""
    try:
        info = pltpu.get_tpu_info()
        for name in ("num_cores", "core_count", "num_tensorcores",
                     "tensorcores_per_chip", "cores_per_chip"):
            v = getattr(info, name, None)
            if isinstance(v, int) and 1 <= v <= 8:
                return v
    except Exception:
        pass
    return 1


def _round_up(v, m):
    return -(-int(v) // m) * m


def _choose_tile_s(s, tile_n, c, itemsize, budget_bytes, override=None):
    """Spatial tile: multiple of 128, sized against the VMEM budget, balanced so
    the cdiv(s, tile_s) chunks waste less than 128 lanes each."""
    s128 = _round_up(s, 128)
    if override is not None:
        # Enforce a minimum effective tile (small tiles -> tiny strided DMAs).
        return min(max(512, _round_up(override, 128)), s128)
    max_tile = (budget_bytes // (itemsize * tile_n * c)) // 128 * 128
    max_tile = min(max(max_tile, 128), s128)
    nk = -(-s // max_tile)
    return _round_up(-(-s // nk), 128)


# ---------------------------------------------------------------------------
# In-kernel spatial accumulation (handles the ragged tail chunk statically)
# ---------------------------------------------------------------------------
def _accum_chunk(x_ref, acc_ref, gk, *, nk_total, valid_last):
    """acc += spatial sum of chunk `gk` of the (tile_n, C, tile_s) block.

    The global tail chunk (gk == nk_total - 1) only has `valid_last` valid
    lanes; it is summed via 128-aligned static slices plus one masked 128-lane
    group, so the only extra temp is (tile_n, C, 128).  Chunks with
    gk >= nk_total (possible only on the split path) contribute nothing.
    """
    tile_s = x_ref.shape[-1]

    if valid_last == tile_s:
        @pl.when(gk < nk_total)
        def _():
            acc_ref[...] += jnp.sum(x_ref[...].astype(jnp.float32), axis=-1)
    else:
        @pl.when(gk < nk_total - 1)
        def _():
            acc_ref[...] += jnp.sum(x_ref[...].astype(jnp.float32), axis=-1)

        @pl.when(gk == nk_total - 1)
        def _():
            vf = (valid_last // 128) * 128          # static, 128-aligned prefix
            part = valid_last - vf                  # static, in [0, 128)
            if vf > 0:
                acc_ref[...] += jnp.sum(
                    x_ref[:, :, :vf].astype(jnp.float32), axis=-1)
            if part > 0:
                grp = x_ref[:, :, vf:vf + 128].astype(jnp.float32)
                lane = lax.broadcasted_iota(jnp.int32, grp.shape, 2)
                acc_ref[...] += jnp.sum(jnp.where(lane < part, grp, 0.0), axis=-1)


# ---------------------------------------------------------------------------
# Kernels
# ---------------------------------------------------------------------------
def _fused_kernel(x_ref, w1_ref, b1_ref, w2_ref, b2_ref, w3_ref, b3_ref,
                  o_ref, acc_ref, *, inv_spatial, nk_total, valid_last):
    """Streaming spatial mean + both MLP heads (as one block-diagonal MLP)."""
    k = pl.program_id(1)

    @pl.when(k == 0)
    def _():
        acc_ref[...] = jnp.zeros_like(acc_ref)

    _accum_chunk(x_ref, acc_ref, k, nk_total=nk_total, valid_last=valid_last)

    @pl.when(k == nk_total - 1)
    def _():
        pooled = acc_ref[...] * inv_spatial          # (tile_n, C) mean over D*H*W
        h = jnp.dot(pooled, w1_ref[...], preferred_element_type=jnp.float32) + b1_ref[...]
        h = jnp.where(h > 0, h, LEAKY_SLOPE * h)
        h = jnp.dot(h, w2_ref[...], preferred_element_type=jnp.float32) + b2_ref[...]
        h = jnp.where(h > 0, h, LEAKY_SLOPE * h)
        o_ref[...] = jnp.dot(h, w3_ref[...], preferred_element_type=jnp.float32) + b3_ref[...]


def _partial_sum_kernel(x_ref, ps_ref, acc_ref, *, n_splits, k_per_split,
                        nk_total, valid_last):
    """Per-(batch-block, spatial-split) partial spatial sums (megacore path)."""
    p = pl.program_id(0)
    k = pl.program_id(1)

    @pl.when(k == 0)
    def _():
        acc_ref[...] = jnp.zeros_like(acc_ref)

    gk = (p % n_splits) * k_per_split + k            # global spatial-chunk index
    _accum_chunk(x_ref, acc_ref, gk, nk_total=nk_total, valid_last=valid_last)

    @pl.when(k == k_per_split - 1)
    def _():
        ps_ref[...] = acc_ref[...]


# ---------------------------------------------------------------------------
# Head parameter fusion + plain-JAX heads (split-path epilogue / reference)
# ---------------------------------------------------------------------------
def _combine_head_params(p1, p2):
    """Fuse both heads into one 3-layer MLP: layer-1 weights concatenated,
    layers 2/3 block-diagonal, layer-3 lane-padded to OUT_PAD output columns
    (coord1 -> cols [0, od), coord2 -> cols [od, 2*od))."""
    f32 = jnp.float32
    w1a, w1b = p1["w1"].astype(f32), p2["w1"].astype(f32)
    w2a, w2b = p1["w2"].astype(f32), p2["w2"].astype(f32)
    w3a, w3b = p1["w3"].astype(f32), p2["w3"].astype(f32)
    h1, h2, od = w1a.shape[1], w2a.shape[1], w3a.shape[1]

    w1 = jnp.concatenate([w1a, w1b], axis=1)
    b1 = jnp.concatenate([p1["b1"].reshape(1, -1), p2["b1"].reshape(1, -1)],
                         axis=1).astype(f32)
    w2 = (jnp.zeros((2 * h1, 2 * h2), f32)
          .at[:h1, :h2].set(w2a).at[h1:, h2:].set(w2b))
    b2 = jnp.concatenate([p1["b2"].reshape(1, -1), p2["b2"].reshape(1, -1)],
                         axis=1).astype(f32)
    w3 = (jnp.zeros((2 * h2, OUT_PAD), f32)
          .at[:h2, :od].set(w3a).at[h2:, od:2 * od].set(w3b))
    b3 = (jnp.zeros((1, OUT_PAD), f32)
          .at[:, :od].set(p1["b3"].reshape(1, -1).astype(f32))
          .at[:, od:2 * od].set(p2["b3"].reshape(1, -1).astype(f32)))
    return (w1, b1, w2, b2, w3, b3), od


def _mlp_heads(pooled, p1, p2):
    def head(p):
        h = pooled @ p["w1"] + p["b1"].reshape(1, -1)
        h = jnp.where(h > 0, h, LEAKY_SLOPE * h)
        h = h @ p["w2"] + p["b2"].reshape(1, -1)
        h = jnp.where(h > 0, h, LEAKY_SLOPE * h)
        return h @ p["w3"] + p["b3"].reshape(1, -1)
    return head(p1), head(p2)


# ---------------------------------------------------------------------------
# Wrapper
# ---------------------------------------------------------------------------
def coordinate_head_forward(x, coord1_params, coord2_params, *,
                            spatial_tile=None, spatial_splits=None):
    """x: (N, C, D, H, W).  Matches torch: AdaptiveAvgPool3d((1,1,1)) -> squeeze
    -> coord1 / coord2 MLPs.  For N == 1 torch's .squeeze() drops the batch
    axis, so outputs are (3,)."""
    n, c, d, h, w = x.shape
    s = d * h * w
    x3 = x.reshape(n, c, s)                          # metadata-only reshape

    budget, vmem_limit = _vmem_plan()
    tile_n = min(n, 8)                               # keeps (8,128) store constraints
    batch_blocks = int(pl.cdiv(n, tile_n))
    tile_s = _choose_tile_s(s, tile_n, c, x3.dtype.itemsize, budget, spatial_tile)
    nk_total = int(pl.cdiv(s, tile_s))
    valid_last = int(s - (nk_total - 1) * tile_s)    # static, in (0, tile_s]

    if spatial_splits is None:
        cores = _detect_num_tensorcores()
        spatial_splits = cores if (batch_blocks == 1 and cores > 1
                                   and nk_total >= cores) else 1
    n_splits = max(1, min(int(spatial_splits), nk_total))

    p1, p2 = coord1_params, coord2_params
    (w1, b1, w2, b2, w3, b3), od = _combine_head_params(p1, p2)

    x_bytes = int(x3.size) * x3.dtype.itemsize
    param_bytes = sum(int(a.size) * 4 for a in (w1, b1, w2, b2, w3, b3))

    if n_splits == 1:
        # ---- fully fused: spatial mean + both MLP heads in one pallas_call
        kernel = functools.partial(_fused_kernel, inv_spatial=1.0 / float(s),
                                   nk_total=nk_total, valid_last=valid_last)
        wspec = lambda a: pl.BlockSpec(a.shape, lambda i, k: (0, 0))
        cost = pl.CostEstimate(
            flops=int(2 * n * c * s
                      + 2 * n * (w1.shape[0] * w1.shape[1]
                                 + w2.shape[0] * w2.shape[1]
                                 + w3.shape[0] * w3.shape[1])),
            transcendentals=0,
            bytes_accessed=int(x_bytes + param_bytes + n * OUT_PAD * 4))
        out = pl.pallas_call(
            kernel,
            out_shape=jax.ShapeDtypeStruct((n, OUT_PAD), jnp.float32),
            grid_spec=pltpu.PrefetchScalarGridSpec(
                num_scalar_prefetch=0,
                grid=(batch_blocks, nk_total),
                in_specs=[
                    pl.BlockSpec((tile_n, c, tile_s), lambda i, k: (i, 0, k)),
                    wspec(w1), wspec(b1), wspec(w2), wspec(b2), wspec(w3), wspec(b3),
                ],
                out_specs=pl.BlockSpec((tile_n, OUT_PAD), lambda i, k: (i, 0)),
                scratch_shapes=[pltpu.VMEM((tile_n, c), jnp.float32)],
            ),
            compiler_params=pltpu.CompilerParams(
                dimension_semantics=("parallel", "arbitrary"),
                vmem_limit_bytes=vmem_limit),
            cost_estimate=cost,
        )(x3, w1, b1, w2, b2, w3, b3)
        coord1, coord2 = out[:, :od], out[:, od:2 * od]
    else:
        # ---- megacore path (v7x with degenerate batch axis): each split
        # streams a contiguous range of spatial chunks into its own partial
        # sum; the tiny mean + MLP epilogue runs in the wrapper.
        k_per_split = int(pl.cdiv(nk_total, n_splits))
        num_p = batch_blocks * n_splits

        def x_map(pp, kk):
            bb = pp // n_splits
            gk = (pp % n_splits) * k_per_split + kk
            return (bb, 0, jnp.minimum(gk, nk_total - 1))

        kernel = functools.partial(_partial_sum_kernel, n_splits=n_splits,
                                   k_per_split=k_per_split, nk_total=nk_total,
                                   valid_last=valid_last)
        cost = pl.CostEstimate(
            flops=int(2 * n * c * s), transcendentals=0,
            bytes_accessed=int(x_bytes + num_p * tile_n * c * 4))
        psum = pl.pallas_call(
            kernel,
            out_shape=jax.ShapeDtypeStruct((num_p, tile_n, c), jnp.float32),
            grid_spec=pltpu.PrefetchScalarGridSpec(
                num_scalar_prefetch=0,
                grid=(num_p, k_per_split),
                in_specs=[pl.BlockSpec((tile_n, c, tile_s), x_map)],
                out_specs=pl.BlockSpec((None, tile_n, c), lambda pp, kk: (pp, 0, 0)),
                scratch_shapes=[pltpu.VMEM((tile_n, c), jnp.float32)],
            ),
            compiler_params=pltpu.CompilerParams(
                dimension_semantics=("parallel", "arbitrary"),
                vmem_limit_bytes=vmem_limit),
            cost_estimate=cost,
        )(x3)
        sums = psum.reshape(batch_blocks, n_splits, tile_n, c).sum(axis=1)
        pooled = sums.reshape(batch_blocks * tile_n, c)[:n] * (1.0 / float(s))
        coord1, coord2 = _mlp_heads(pooled, p1, p2)

    if n == 1:   # torch .squeeze() drops the batch axis -> (3,)
        return {"coord1": coord1.reshape(od), "coord2": coord2.reshape(od)}
    return {"coord1": coord1, "coord2": coord2}


# ---------------------------------------------------------------------------
# Parameter init (shapes follow the PyTorch module) + plain-JAX reference
# ---------------------------------------------------------------------------
def init_head_params(key, in_channels):
    h1 = in_channels // 2
    h2 = in_channels // 4
    dims = [(in_channels, h1), (h1, h2), (h2, 3)]
    params = {}
    for i, (fin, fout) in enumerate(dims, start=1):
        key, kw, kb = jax.random.split(key, 3)
        bound = 1.0 / jnp.sqrt(jnp.float32(fin))  # PyTorch Linear default init range
        params[f"w{i}"] = jax.random.uniform(kw, (fin, fout), jnp.float32, -bound, bound)
        params[f"b{i}"] = jax.random.uniform(kb, (1, fout), jnp.float32, -bound, bound)
    return params, key


def _ref_forward(x, p1, p2):
    pooled = jnp.mean(x.astype(jnp.float32), axis=(2, 3, 4))
    return _mlp_heads(pooled, p1, p2)


if __name__ == "__main__":
    N, C, D, H, W = 2, 32, 8, 8, 11      # S = 704: not a multiple of 128 -> ragged tail
    key = jax.random.PRNGKey(0)
    key, kx = jax.random.split(key)
    x = jax.random.normal(kx, (N, C, D, H, W), jnp.float32)

    coord1_params, key = init_head_params(key, C)
    coord2_params, key = init_head_params(key, C)
    ref1, ref2 = _ref_forward(x, coord1_params, coord2_params)

    def check(out, r1, r2, shape):
        assert out["coord1"].shape == shape and out["coord2"].shape == shape
        assert jnp.allclose(out["coord1"], r1, atol=1e-5)
        assert jnp.allclose(out["coord2"], r2, atol=1e-5)

    # 1) default fused path (one big spatial chunk, masked ragged tail)
    out = coordinate_head_forward(x, coord1_params, coord2_params)
    jax.block_until_ready(out)
    check(out, ref1, ref2, (N, 3))

    # 2) multi-chunk spatial reduction (tile 512 -> 2 chunks, tail masked)
    out = coordinate_head_forward(x, coord1_params, coord2_params, spatial_tile=512)
    jax.block_until_ready(out)
    check(out, ref1, ref2, (N, 3))

    # 3) 2-way spatial split (megacore path; correct on 1-core chips too)
    out = coordinate_head_forward(x, coord1_params, coord2_params,
                                  spatial_tile=512, spatial_splits=2)
    jax.block_until_ready(out)
    check(out, ref1, ref2, (N, 3))

    # 4) batch > 8 and not a multiple of 8: cdiv batch grid with clipped tail rows
    key, kx2 = jax.random.split(key)
    xb = jax.random.normal(kx2, (11, C, D, H, W), jnp.float32)
    rb1, rb2 = _ref_forward(xb, coord1_params, coord2_params)
    outb = coordinate_head_forward(xb, coord1_params, coord2_params)
    jax.block_until_ready(outb)
    check(outb, rb1, rb2, (11, 3))

    # 5) N == 1: torch .squeeze() semantics -> (3,) outputs
    x1 = x[:1]
    r1, r2 = _ref_forward(x1, coord1_params, coord2_params)
    out1 = coordinate_head_forward(x1, coord1_params, coord2_params)
    jax.block_until_ready(out1)
    assert out1["coord1"].shape == (3,) and out1["coord2"].shape == (3,)
    assert jnp.allclose(out1["coord1"], r1.reshape(3), atol=1e-5)
    assert jnp.allclose(out1["coord2"], r2.reshape(3), atol=1e-5)

    print("KERNEL_OK")
</pallas_src>

<mosaic_0001>
module attributes {stable_mosaic.version = 11 : i64} {
  func.func @_fused_kernel(%arg0: i32, %arg1: i32, %arg2: memref<2x32x768xf32, #tpu.memory_space<vmem>>, %arg3: memref<32x32xf32, #tpu.memory_space<vmem>>, %arg4: memref<1x32xf32, #tpu.memory_space<vmem>>, %arg5: memref<32x16xf32, #tpu.memory_space<vmem>>, %arg6: memref<1x16xf32, #tpu.memory_space<vmem>>, %arg7: memref<16x128xf32, #tpu.memory_space<vmem>>, %arg8: memref<1x128xf32, #tpu.memory_space<vmem>>, %arg9: memref<2x128xf32, #tpu.memory_space<vmem>>, %arg10: memref<2x32xf32, #tpu.memory_space<vmem>>) attributes {dimension_semantics = [#tpu.dimension_semantics<parallel>, #tpu.dimension_semantics<arbitrary>], iteration_bounds = array<i64: 1, 1>, scalar_prefetch = 0 : i64, scratch_operands = 1 : i64, tpu.core_type = #tpu.core_type<tc>, window_params = [{transform_indices = @transform_0, window_bounds = array<i64: 2, 32, 768>}, {pipeline_mode = #tpu.pipeline_mode<synchronous>, transform_indices = @transform_1, window_bounds = array<i64: 32, 32>}, {pipeline_mode = #tpu.pipeline_mode<synchronous>, transform_indices = @transform_2, window_bounds = array<i64: 1, 32>}, {pipeline_mode = #tpu.pipeline_mode<synchronous>, transform_indices = @transform_3, window_bounds = array<i64: 32, 16>}, {pipeline_mode = #tpu.pipeline_mode<synchronous>, transform_indices = @transform_4, window_bounds = array<i64: 1, 16>}, {pipeline_mode = #tpu.pipeline_mode<synchronous>, transform_indices = @transform_5, window_bounds = array<i64: 16, 128>}, {pipeline_mode = #tpu.pipeline_mode<synchronous>, transform_indices = @transform_6, window_bounds = array<i64: 1, 128>}, {transform_indices = @transform_7, window_bounds = array<i64: 2, 128>}]} {
    %c0_i32 = arith.constant 0 : i32
    %0 = arith.cmpi eq, %arg1, %c0_i32 : i32
    %1 = arith.extui %0 : i1 to i32
    %c0_i32_0 = arith.constant 0 : i32
    %2 = arith.cmpi ne, %1, %c0_i32_0 : i32
    scf.if %2 {
      %cst = arith.constant 0.000000e+00 : f32
      %12 = vector.broadcast %cst : f32 to vector<2x32xf32>
      %c0 = arith.constant 0 : index
      %c0_7 = arith.constant 0 : index
      %13 = vector.load %arg10[%c0, %c0_7] : memref<2x32xf32, #tpu.memory_space<vmem>>, vector<2x32xf32>
      tpu.vector_store %arg10[%c0, %c0_7], %12 {strides = array<i32>} : memref<2x32xf32, #tpu.memory_space<vmem>>, vector<2x32xf32>,
    } else {
    }
    %c0_i32_1 = arith.constant 0 : i32
    %3 = arith.cmpi slt, %arg1, %c0_i32_1 : i32
    %4 = arith.extui %3 : i1 to i32
    %c0_i32_2 = arith.constant 0 : i32
    %5 = arith.cmpi ne, %4, %c0_i32_2 : i32
    scf.if %5 {
      %c0 = arith.constant 0 : index
      %c0_7 = arith.constant 0 : index
      %12 = vector.load %arg10[%c0, %c0_7] : memref<2x32xf32, #tpu.memory_space<vmem>>, vector<2x32xf32>
      %c0_8 = arith.constant 0 : index
      %c0_9 = arith.constant 0 : index
      %c0_10 = arith.constant 0 : index
      %13 = vector.load %arg2[%c0_8, %c0_9, %c0_10] : memref<2x32x768xf32, #tpu.memory_space<vmem>>, vector<2x32x768xf32>
      %cst = arith.constant dense<0.000000e+00> : vector<2x32xf32>
      %14 = vector.multi_reduction <add>, %13, %cst [2] : vector<2x32x768xf32> to vector<2x32xf32>
      %15 = arith.addf %12, %14 : vector<2x32xf32>
      %c0_11 = arith.constant 0 : index
      %c0_12 = arith.constant 0 : index
      %16 = vector.load %arg10[%c0_11, %c0_12] : memref<2x32xf32, #tpu.memory_space<vmem>>, vector<2x32xf32>
      tpu.vector_store %arg10[%c0_11, %c0_12], %15 {strides = array<i32>} : memref<2x32xf32, #tpu.memory_space<vmem>>, vector<2x32xf32>,
    } else {
    }
    %c0_i32_3 = arith.constant 0 : i32
    %6 = arith.cmpi eq, %arg1, %c0_i32_3 : i32
    %7 = arith.extui %6 : i1 to i32
    %c0_i32_4 = arith.constant 0 : i32
    %8 = arith.cmpi ne, %7, %c0_i32_4 : i32
    scf.if %8 {
      %c0 = arith.constant 0 : index
      %c0_7 = arith.constant 0 : index
      %12 = vector.load %arg10[%c0, %c0_7] : memref<2x32xf32, #tpu.memory_space<vmem>>, vector<2x32xf32>
      %c0_8 = arith.constant 0 : index
      %c0_9 = arith.constant 0 : index
      %c0_10 = arith.constant 0 : index
      %13 = vector.load %arg2[%c0_8, %c0_9, %c0_10] : memref<2x32x768xf32, #tpu.memory_space<vmem>>, vector<2x32x640xf32>
      %cst = arith.constant dense<0.000000e+00> : vector<2x32xf32>
      %14 = vector.multi_reduction <add>, %13, %cst [2] : vector<2x32x640xf32> to vector<2x32xf32>
      %15 = arith.addf %12, %14 : vector<2x32xf32>
      %c0_11 = arith.constant 0 : index
      %c0_12 = arith.constant 0 : index
      %16 = vector.load %arg10[%c0_11, %c0_12] : memref<2x32xf32, #tpu.memory_space<vmem>>, vector<2x32xf32>
      tpu.vector_store %arg10[%c0_11, %c0_12], %15 {strides = array<i32>} : memref<2x32xf32, #tpu.memory_space<vmem>>, vector<2x32xf32>,
      %c0_13 = arith.constant 0 : index
      %c0_14 = arith.constant 0 : index
      %c640 = arith.constant 640 : index
      %17 = vector.load %arg2[%c0_13, %c0_14, %c640] : memref<2x32x768xf32, #tpu.memory_space<vmem>>, vector<2x32x128xf32>
      %18 = tpu.iota {dimensions = array<i32: 2>} : vector<2x32x128xi32>
      %c0_15 = arith.constant 0 : index
      %c0_16 = arith.constant 0 : index
      %19 = vector.load %arg10[%c0_15, %c0_16] : memref<2x32xf32, #tpu.memory_space<vmem>>, vector<2x32xf32>
      %c64_i32 = arith.constant 64 : i32
      %20 = vector.broadcast %c64_i32 : i32 to vector<2x32x128xi32>
      %21 = arith.cmpi slt, %18, %20 : vector<2x32x128xi32>
      %cst_17 = arith.constant 0.000000e+00 : f32
      %22 = vector.broadcast %cst_17 : f32 to vector<2x32x128xf32>
      %23 = arith.select %21, %17, %22 : vector<2x32x128xi1>, vector<2x32x128xf32>
      %cst_18 = arith.constant dense<0.000000e+00> : vector<2x32xf32>
      %24 = vector.multi_reduction <add>, %23, %cst_18 [2] : vector<2x32x128xf32> to vector<2x32xf32>
      %25 = arith.addf %19, %24 : vector<2x32xf32>
      %c0_19 = arith.constant 0 : index
      %c0_20 = arith.constant 0 : index
      %26 = vector.load %arg10[%c0_19, %c0_20] : memref<2x32xf32, #tpu.memory_space<vmem>>, vector<2x32xf32>
      tpu.vector_store %arg10[%c0_19, %c0_20], %25 {strides = array<i32>} : memref<2x32xf32, #tpu.memory_space<vmem>>, vector<2x32xf32>,
    } else {
    }
    %c0_i32_5 = arith.constant 0 : i32
    %9 = arith.cmpi eq, %arg1, %c0_i32_5 : i32
    %10 = arith.extui %9 : i1 to i32
    %c0_i32_6 = arith.constant 0 : i32
    %11 = arith.cmpi ne, %10, %c0_i32_6 : i32
    scf.if %11 {
      %c0 = arith.constant 0 : index
      %c0_7 = arith.constant 0 : index
      %12 = vector.load %arg10[%c0, %c0_7] : memref<2x32xf32, #tpu.memory_space<vmem>>, vector<2x32xf32>
      %cst = arith.constant 0.00142045459 : f32
      %13 = vector.broadcast %cst : f32 to vector<2x32xf32>
      %14 = arith.mulf %12, %13 : vector<2x32xf32>
      %c0_8 = arith.constant 0 : index
      %c0_9 = arith.constant 0 : index
      %15 = vector.load %arg3[%c0_8, %c0_9] : memref<32x32xf32, #tpu.memory_space<vmem>>, vector<32x32xf32>
      %cst_10 = arith.constant dense<0.000000e+00> : vector<2x32xf32>
      %16 = tpu.matmul %14, %15, %cst_10 {dimension_numbers = #tpu.dot_dimension_numbers<[1], [0], [0], [1], [0, 0, 1, 1], [], []>} : vector<2x32xf32>, vector<32x32xf32>, vector<2x32xf32> -> vector<2x32xf32>
      %c0_11 = arith.constant 0 : index
      %c0_12 = arith.constant 0 : index
      %17 = vector.load %arg4[%c0_11, %c0_12] : memref<1x32xf32, #tpu.memory_space<vmem>>, vector<1x32xf32>
      %18 = vector.broadcast %17 : vector<1x32xf32> to vector<2x32xf32>
      %19 = arith.addf %16, %18 : vector<2x32xf32>
      %cst_13 = arith.constant 0.000000e+00 : f32
      %20 = vector.broadcast %cst_13 : f32 to vector<2x32xf32>
      %21 = arith.cmpf ogt, %19, %20 : vector<2x32xf32>
      %cst_14 = arith.constant 0.00999999977 : f32
      %22 = vector.broadcast %cst_14 : f32 to vector<2x32xf32>
      %23 = arith.mulf %22, %19 : vector<2x32xf32>
      %24 = arith.select %21, %19, %23 : vector<2x32xi1>, vector<2x32xf32>
      %c0_15 = arith.constant 0 : index
      %c0_16 = arith.constant 0 : index
      %25 = vector.load %arg5[%c0_15, %c0_16] : memref<32x16xf32, #tpu.memory_space<vmem>>, vector<32x16xf32>
      %cst_17 = arith.constant dense<0.000000e+00> : vector<2x16xf32>
      %26 = tpu.matmul %24, %25, %cst_17 {dimension_numbers = #tpu.dot_dimension_numbers<[1], [0], [0], [1], [0, 0, 1, 1], [], []>} : vector<2x32xf32>, vector<32x16xf32>, vector<2x16xf32> -> vector<2x16xf32>
      %c0_18 = arith.constant 0 : index
      %c0_19 = arith.constant 0 : index
      %27 = vector.load %arg6[%c0_18, %c0_19] : memref<1x16xf32, #tpu.memory_space<vmem>>, vector<1x16xf32>
      %28 = vector.broadcast %27 : vector<1x16xf32> to vector<2x16xf32>
      %29 = arith.addf %26, %28 : vector<2x16xf32>
      %cst_20 = arith.constant 0.000000e+00 : f32
      %30 = vector.broadcast %cst_20 : f32 to vector<2x16xf32>
      %31 = arith.cmpf ogt, %29, %30 : vector<2x16xf32>
      %cst_21 = arith.constant 0.00999999977 : f32
      %32 = vector.broadcast %cst_21 : f32 to vector<2x16xf32>
      %33 = arith.mulf %32, %29 : vector<2x16xf32>
      %34 = arith.select %31, %29, %33 : vector<2x16xi1>, vector<2x16xf32>
      %c0_22 = arith.constant 0 : index
      %c0_23 = arith.constant 0 : index
      %35 = vector.load %arg7[%c0_22, %c0_23] : memref<16x128xf32, #tpu.memory_space<vmem>>, vector<16x128xf32>
      %cst_24 = arith.constant dense<0.000000e+00> : vector<2x128xf32>
      %36 = tpu.matmul %34, %35, %cst_24 {dimension_numbers = #tpu.dot_dimension_numbers<[1], [0], [0], [1], [0, 0, 1, 1], [], []>} : vector<2x16xf32>, vector<16x128xf32>, vector<2x128xf32> -> vector<2x128xf32>
      %c0_25 = arith.constant 0 : index
      %c0_26 = arith.constant 0 : index
      %37 = vector.load %arg8[%c0_25, %c0_26] : memref<1x128xf32, #tpu.memory_space<vmem>>, vector<1x128xf32>
      %38 = vector.broadcast %37 : vector<1x128xf32> to vector<2x128xf32>
      %39 = arith.addf %36, %38 : vector<2x128xf32>
      %c0_27 = arith.constant 0 : index
      %c0_28 = arith.constant 0 : index
      %40 = vector.load %arg9[%c0_27, %c0_28] : memref<2x128xf32, #tpu.memory_space<vmem>>, vector<2x128xf32>
      tpu.vector_store %arg9[%c0_27, %c0_28], %39 {strides = array<i32>} : memref<2x128xf32, #tpu.memory_space<vmem>>, vector<2x128xf32>,
    } else {
    }
    return
  }
  func.func @transform_0(%arg0: i32, %arg1: i32) -> (i32, i32, i32) {
    %c0_i32 = arith.constant 0 : i32
    %c0_i32_0 = arith.constant 0 : i32
    return %arg0, %c0_i32, %arg1 : i32, i32, i32
  }
  func.func @transform_1(%arg0: i32, %arg1: i32) -> (i32, i32) {
    %c0_i32 = arith.constant 0 : i32
    %c0_i32_0 = arith.constant 0 : i32
    %c0_i32_1 = arith.constant 0 : i32
    return %c0_i32, %c0_i32_0 : i32, i32
  }
  func.func @transform_2(%arg0: i32, %arg1: i32) -> (i32, i32) {
    %c0_i32 = arith.constant 0 : i32
    %c0_i32_0 = arith.constant 0 : i32
    %c0_i32_1 = arith.constant 0 : i32
    return %c0_i32, %c0_i32_0 : i32, i32
  }
  func.func @transform_3(%arg0: i32, %arg1: i32) -> (i32, i32) {
    %c0_i32 = arith.constant 0 : i32
    %c0_i32_0 = arith.constant 0 : i32
    %c0_i32_1 = arith.constant 0 : i32
    return %c0_i32, %c0_i32_0 : i32, i32
  }
  func.func @transform_4(%arg0: i32, %arg1: i32) -> (i32, i32) {
    %c0_i32 = arith.constant 0 : i32
    %c0_i32_0 = arith.constant 0 : i32
    %c0_i32_1 = arith.constant 0 : i32
    return %c0_i32, %c0_i32_0 : i32, i32
  }
  func.func @transform_5(%arg0: i32, %arg1: i32) -> (i32, i32) {
    %c0_i32 = arith.constant 0 : i32
    %c0_i32_0 = arith.constant 0 : i32
    %c0_i32_1 = arith.constant 0 : i32
    return %c0_i32, %c0_i32_0 : i32, i32
  }
  func.func @transform_6(%arg0: i32, %arg1: i32) -> (i32, i32) {
    %c0_i32 = arith.constant 0 : i32
    %c0_i32_0 = arith.constant 0 : i32
    %c0_i32_1 = arith.constant 0 : i32
    return %c0_i32, %c0_i32_0 : i32, i32
  }
  func.func @transform_7(%arg0: i32, %arg1: i32) -> (i32, i32) {
    %c0_i32 = arith.constant 0 : i32
    %c0_i32_0 = arith.constant 0 : i32
    return %arg0, %c0_i32 : i32, i32
  }
}

</mosaic_0001>

<bundles_post_ra>
// kernel: tpu_custom_call.1
= control target key start
LH: loop header
LB: loop body
LE: loop exit
PB: predicated region body
PF: predicated region fallthrough
CT: control target
= control target key end

     0   :  { %12 = vsyncpa [#allocation4], 0  ;;  %s697_s0 = inlined_call_operand.hbm [shape: f32[2,32,704], index: 0, kind: input, shape index: {}]   ;;  %s698_s1 = inlined_call_operand.vmem [shape: f32[32,32], index: 1, kind: input, shape index: {}]   ;;  %s699_s2 = inlined_call_operand.vmem [shape: f32[1,32], index: 2, kind: input, shape index: {}]   ;;  %s700_s3 = inlined_call_operand.vmem [shape: f32[32,16], index: 3, kind: input, shape index: {}]   ;;  %s701_s4 = inlined_call_operand.vmem [shape: f32[1,16], index: 4, kind: input, shape index: {}]   ;;  %s702_s5 = inlined_call_operand.vmem [shape: f32[16,128], index: 5, kind: input, shape index: {}]   ;;  %s703_s6 = inlined_call_operand.vmem [shape: f32[1,128], index: 6, kind: input, shape index: {}]   ;;  %s704_s7 = inlined_call_operand.hbm [shape: f32[2,128], index: 7, kind: output, shape index: {}]  }
   0x1   :  { %13 = vsyncpa [#allocation5], 0  ;;  %s18_s26 = sshll.u32 %s697_s0, 4  ;;  %s564_s27 = smov [#allocation3]   ;;  %s19_s26 = int_to_ptr.hbm [resolvable:$true] %s18_s26 }
   0x2   :  { %s20_s28 = sshll.u32 %s564_s27, 4  ;;  %s565_s29 = smov 768   ;;  %s21_s28 = int_to_ptr.vmem [resolvable:$true] %s20_s28 }
   0x3   :  { %s566_s30 = smov 48  }
   0x4   :  { %26 = dma.hbm_to_vmem [thread:$0]  %s19_s26, 6144, %s21_s28, [#allocation4], %s565_s29, %s565_s29, %s566_s30  }
   0x5   :  { %560 = dma.done.wait [#allocation4], 6144  }
   0x6   :  { %561 = vsyncadd [#allocation4], 4294961152  ;;  %v294_v0 = vlaneseq  ;;  %v322_v2 = vld [vmem:[#allocation3 + $0x28] sm:$0xff]  ;;  %v218_v3 = vld [vmem:[#allocation3 + $0xc0] sm:$0xff]  ;;  %vm47_vm1 = vcmask 254976   ;;  %vm299_vm2 = vcmask 130112  }
   0x7   :  { %v219_v4 = vld [vmem:[#allocation3 + $0xc8] sm:$0xff]  ;;  %v220_v6 = vld [vmem:[#allocation3 + $0xd0] sm:$0xff]  ;;  %v221_v7 = vld [vmem:[#allocation3 + $0xd8] sm:$0xff]  ;;  %vm303_vm3 = vcmask 195712   ;;  %vm307_vm4 = vcmask 261312   ;;  %vm316_vm5 = vcmask 1041409  }
   0x8   :  { %v612_v1 = vand.u32 127, %v294_v0  ;;  %v262_v8 = vadd.f32 %v219_v4, %v218_v3  ;;  %v198_v9 = vld [vmem:[#allocation3] sm:$0xff]  ;;  %v199_v10 = vld [vmem:[#allocation3 + $0x8] sm:$0xff]  ;;  %v200_v11 = vld [vmem:[#allocation3 + $0x10] sm:$0xff]  ;;  %vm392_vm6 = vcmask 261120   ;;  %vm459_vm9 = vcmask 130048  }
   0x9   :  { %v222_v12 = vld [vmem:[#allocation3 + $0xe0] sm:$0xff]  ;;  %v238_v14 = vadd.f32 %v199_v10, %v198_v9  ;;  %v201_v16 = vld [vmem:[#allocation3 + $0x18] sm:$0xff]  ;;  %v209_v17 = vld [vmem:[#allocation3 + $0x68] sm:$0xff]  ;;  %s568_s30 = smov [#allocation6]   ;;  %s491_s9 = sshll.u32 %s704_s7, 4  ;;  %s492_s9 = int_to_ptr.hbm [resolvable:$true] %s491_s9 }
   0xa   :  { %vm331_vm0 = vcmp.lt.s32.totalorder %v612_v1, 64  ;;  %v263_v13 = vadd.f32 %v262_v8, %v220_v6  ;;  %v208_v15 = vld [vmem:[#allocation3 + $0x60] sm:$0xff]  ;;  %v210_v18 = vld [vmem:[#allocation3 + $0x70] sm:$0xff]  ;;  %v224_v24 = vld [vmem:[#allocation3 + $0xf8] sm:$0xff]  ;;  %s489_s0 = sshll.u32 %s568_s30, 4  ;;  %s490_s0 = int_to_ptr.vmem [resolvable:$true] %s489_s0 }
   0xb   :  { %v332_v5 = vsel %vm331_vm0, %v322_v2, 0.0  ;;  %v202_v20 = vld [vmem:[#allocation3 + $0x20] sm:$0xff]  ;;  %v239_v21 = vadd.f32 %v238_v14, %v200_v11  ;;  %v250_v22 = vadd.f32 %v209_v17, %v208_v15  ;;  %v223_v23 = vld [vmem:[#allocation3 + $0xf0] sm:$0xff]  ;;  %v211_v25 = vld [vmem:[#allocation3 + $0x78] sm:$0xff] }
   0xc   :  { %340 = vadd.xlane.f32.xlu2 %v332_v5  ;;  %v264_v19 = vadd.f32 %v263_v13, %v221_v7  ;;  %v225_v26 = vld [vmem:[#allocation3 + $0x100] sm:$0xff]  ;;  %v226_v27 = vld [vmem:[#allocation3 + $0x108] sm:$0xff]  ;;  %v268_v28 = vadd.f32 %v224_v24, %v223_v23  ;;  %v203_v32 = vld [vmem:[#allocation3 + $0x30] sm:$0xff] }
   0xd   :  { %v240_v30 = vadd.f32 %v239_v21, %v201_v16  ;;  %v251_v31 = vadd.f32 %v250_v22, %v210_v18  ;;  %v204_v33 = vld [vmem:[#allocation3 + $0x38] sm:$0xff]  ;;  %v205_v34 = vld [vmem:[#allocation3 + $0x40] sm:$0xff]  ;;  %v206_v41 = vld [vmem:[#allocation3 + $0x48] sm:$0xff] }
   0xe   :  { %v265_v29 = vadd.f32 %v264_v19, %v222_v12  ;;  %v212_v35 = vld [vmem:[#allocation3 + $0x80] sm:$0xff]  ;;  %v269_v36 = vadd.f32 %v268_v28, %v225_v26  ;;  %v244_v37 = vadd.f32 %v204_v33, %v203_v32  ;;  %v229_v42 = vld [vmem:[#allocation3 + $0x128] sm:$0xff]  ;;  %v230_v43 = vld [vmem:[#allocation3 + $0x130] sm:$0xff]  ;;  %v297_v32 = vadd.s32 4294967288, %v612_v1 }
   0xf   :  { %v228_v38 = vld [vmem:[#allocation3 + $0x120] sm:$0xff]  ;;  %v241_v39 = vadd.f32 %v240_v30, %v202_v20  ;;  %v252_v40 = vadd.f32 %v251_v31, %v211_v25  ;;  %v227_v44 = vld [vmem:[#allocation3 + $0x110] sm:$0xff]  ;;  %v234_v49 = vld [vmem:[#allocation3 + $0x158] sm:$0xff] }
  0x10   :  { %266 = vadd.xlane.f32.xlu1 %v265_v29  ;;  %v270_v45 = vadd.f32 %v269_v36, %v226_v27  ;;  %v245_v46 = vadd.f32 %v244_v37, %v205_v34  ;;  %v274_v47 = vadd.f32 %v229_v42, %v228_v38  ;;  %v233_v48 = vld [vmem:[#allocation3 + $0x150] sm:$0xff]  ;;  %v231_v52 = vld [vmem:[#allocation3 + $0x138] sm:$0xff]  ;;  %v235_v53 = vld [vmem:[#allocation3 + $0x160] sm:$0xff]  ;;  %v567_v27 = vmov 0.0  }
  0x11   :  { %242 = vadd.xlane.f32.xlu0 %v241_v39  ;;  %v253_v50 = vadd.f32 %v252_v40, %v212_v35  ;;  %v207_v51 = vld [vmem:[#allocation3 + $0x50] sm:$0xff]  ;;  %v280_v54 = vadd.f32 %v234_v49, %v233_v48  ;;  %v214_v58 = vld [vmem:[#allocation3 + $0x98] sm:$0xff]  ;;  %v215_v59 = vld [vmem:[#allocation3 + $0xa0] sm:$0xff]  ;;  %48 = vst.msk [vmem:[#allocation2] sm:$0x3] %vm47_vm1, %v567_v27  ;;  %v301_v34 = vadd.s32 4294967280, %v612_v1 }
  0x12   :  { %v246_v55 = vadd.f32 %v245_v46, %v206_v41  ;;  %v275_v56 = vadd.f32 %v274_v47, %v230_v43  ;;  %v213_v57 = vld [vmem:[#allocation3 + $0x90] sm:$0xff]  ;;  %v271_v60 = vadd.f32 %v270_v45, %v227_v44  ;;  %v232_v63 = vld [vmem:[#allocation3 + $0x140] sm:$0xff]  ;;  %v236_v2 = vld [vmem:[#allocation3 + $0x168] sm:$0xff]  ;;  %v305_v40 = vadd.s32 4294967272, %v612_v1 }
  0x13   :  { %v281_v61 = vadd.f32 %v280_v54, %v235_v53  ;;  %v256_v62 = vadd.f32 %v214_v58, %v213_v57  ;;  %v216_v5 = vld [vmem:[#allocation3 + $0xa8] sm:$0xff]  ;;  %v237_v8 = vld [vmem:[#allocation3 + $0x170] sm:$0xff]  ;;  %v327_v13 = vld [vmem:[#allocation3 + $0x118] sm:$0xff] }
  0x14   :  { %254 = vadd.xlane.f32.xlu2 %v253_v50  ;;  %v276_v0 = vadd.f32 %v275_v56, %v231_v52  ;;  %v247_v3 = vadd.f32 %v246_v55, %v207_v51  ;;  %v217_v10 = vld [vmem:[#allocation3 + $0xb0] sm:$0xff]  ;;  %v337_v14 = vsel %vm331_vm0, %v327_v13, 0.0  ;;  %v326_v15 = vld [vmem:[#allocation3 + $0xe8] sm:$0xff]  ;;  %v323_v16 = vld [vmem:[#allocation3 + $0x58] sm:$0xff] }
  0x15   :  { %v257_v4 = vadd.f32 %v256_v62, %v215_v59  ;;  %v282_v7 = vadd.f32 %v281_v61, %v236_v2  ;;  %v336_v17 = vsel %vm331_vm0, %v326_v15, 0.0  ;;  %v325_v18 = vld [vmem:[#allocation3 + $0xb8] sm:$0xff]  ;;  %v333_v19 = vsel %vm331_vm0, %v323_v16, 0.0  ;;  %v328_v21 = vld [vmem:[#allocation3 + $0x148] sm:$0xff] }
  0x16   :  { %v277_v6 = vadd.f32 %v276_v0, %v232_v63  ;;  %v335_v20 = vsel %vm331_vm0, %v325_v18, 0.0  ;;  %v324_v22 = vld [vmem:[#allocation3 + $0x88] sm:$0xff]  ;;  %v338_v23 = vsel %vm331_vm0, %v328_v21, 0.0  ;;  %v329_v25 = vld [vmem:[#allocation3 + $0x178] sm:$0xff] }
  0x17   :  { %v258_v9 = vadd.f32 %v257_v4, %v216_v5  ;;  %v283_v11 = vadd.f32 %v282_v7, %v237_v8  ;;  %v334_v24 = vsel %vm331_vm0, %v324_v22, 0.0  ;;  %v339_v26 = vsel %vm331_vm0, %v329_v25, 0.0  ;;  %v387_v48 = vld [vmem:[%s698_s1 + $0x18] sm:$0xff]  ;;  %v386_v49 = vld [vmem:[%s698_s1 + $0x10] sm:$0xff]  ;;  %v385_v54 = vld [vmem:[%s698_s1 + $0x8] sm:$0xff] }
  0x18   :  { %272 = vadd.xlane.f32.xlu1 %v271_v60  ;;  %408 = vmatpush.msra.mxu0 %v387_v48  ;;  %v197_v56 = vld [vmem:[#allocation2] sm:$0x3]  ;;  %v422_v63 = vld [vmem:[%s700_s3 + $0x18] sm:$0xff]  ;;  %v420_v25 = vld [vmem:[%s700_s3 + $0x8] sm:$0xff] }
  0x19   :  { %248 = vadd.xlane.f32.xlu0 %v247_v3  ;;  %v259_v12 = vadd.f32 %v258_v9, %v217_v10  ;;  %v384_v58 = vld [vmem:[%s698_s1] sm:$0xff]  ;;  %442 = vmatpush.msra.mxu1 %v422_v63 }
  0x1a   :  { %409 = vmatpush.msra.mxu0 %v386_v49  ;;  %v509_v27 = vld [vmem:[%s699_s2] ss:$0 sm:$0xff] }
  0x1c   :  { %278 = vadd.xlane.f32.xlu2 %v277_v6  ;;  %410 = vmatpush.msra.mxu0 %v385_v54 }
  0x1e   :  { %411 = vmatpush.msra.mxu0 %v384_v58 }
  0x20   :  { %284 = vadd.xlane.f32.xlu1 %v283_v11 }
  0x21   :  { %260 = vadd.xlane.f32.xlu0 %v259_v12 }
  0x24   :  { %350 = vadd.xlane.f32.xlu2 %v337_v14 }
  0x28   :  { %348 = vadd.xlane.f32.xlu1 %v336_v17 }
  0x29   :  { %342 = vadd.xlane.f32.xlu0 %v333_v19 }
  0x2c   :  { %346 = vadd.xlane.f32.xlu2 %v335_v20 }
  0x30   :  { %352 = vadd.xlane.f32.xlu1 %v338_v23 }
  0x31   :  { %344 = vadd.xlane.f32.xlu0 %v334_v24  ;;  %v421_v24 = vld [vmem:[%s700_s3 + $0x10] sm:$0xff] }
  0x32   :  { %443 = vmatpush.msra.mxu1 %v421_v24 }
  0x34   :  { %444 = vmatpush.msra.mxu1 %v420_v25 }
  0x39   :  { %354 = vadd.xlane.f32.xlu0 %v339_v26  ;;  %v419_v26 = vld [vmem:[%s700_s3] sm:$0xff] }
  0x3a   :  { %445 = vmatpush.msra.mxu1 %v419_v26 }
  0x7f   :  { %v341_v28 = vpop.xlane.xlu2 %340 }
  0x80   :  { %v364_v9 = vperm.slane %v341_v28, %v612_v1 }
  0x83   :  { %v267_v29 = vpop.xlane.xlu1 %266 }
  0x84   :  { %v243_v30 = vpop.xlane.xlu0 %242  ;;  %v309_v36 = vperm.slane %v267_v29, %v612_v1 }
  0x85   :  { %v296_v42 = vperm.slane %v243_v30, %v612_v1 }
  0x87   :  { %v255_v31 = vpop.xlane.xlu2 %254 }
  0x88   :  { %v302_v44 = vperm.slane %v255_v31, %v301_v34 }
  0x8b   :  { %v273_v33 = vpop.xlane.xlu1 %272 }
  0x8c   :  { %v249_v35 = vpop.xlane.xlu0 %248  ;;  %v310_v37 = vperm.slane %v273_v33, %v297_v32  ;;  %v453_v33 = vld [vmem:[%s702_s5] sm:$0xff] }
  0x8d   :  { %v298_v39 = vperm.slane %v249_v35, %v297_v32 }
  0x8e   :  { %v311_v43 = vsel %vm299_vm2, %v310_v37, %v309_v36 }
  0x8f   :  { %v279_v38 = vpop.xlane.xlu2 %278  ;;  %v300_v46 = vsel %vm299_vm2, %v298_v39, %v296_v42  ;;  %v511_v39 = vld [vmem:[%s703_s6] ss:$0 sm:$0xff] }
  0x90   :  { %v312_v41 = vperm.slane %v279_v38, %v301_v34  ;;  %v304_v55 = vsel %vm303_vm3, %v302_v44, %v300_v46 }
  0x92   :  { %v313_v50 = vsel %vm303_vm3, %v312_v41, %v311_v43 }
  0x93   :  { %v285_v45 = vpop.xlane.xlu1 %284 }
  0x94   :  { %v314_v47 = vperm.slane %v285_v45, %v305_v40  ;;  %v261_v51 = vpop.xlane.xlu0 %260 }
  0x95   :  { %v306_v53 = vperm.slane %v261_v51, %v305_v40 }
  0x96   :  { %v315_v52 = vsel %vm307_vm4, %v314_v47, %v313_v50 }
  0x97   :  { %v308_v57 = vsel %vm307_vm4, %v306_v53, %v304_v55  ;;  %v351_v0 = vpop.xlane.xlu2 %350 }
  0x98   :  { %v317_v59 = vsel %vm316_vm5, %v315_v52, %v308_v57  ;;  %v372_v5 = vperm.slane %v351_v0, %v297_v32 }
  0x99   :  { %v319_v60 = vadd.f32 %v317_v59, %v197_v56 }
  0x9b   :  { %321 = vst.msk [vmem:[#allocation2] sm:$0x3] %vm47_vm1, %v319_v60  ;;  %v349_v62 = vpop.xlane.xlu1 %348 }
  0x9c   :  { %v343_v61 = vpop.xlane.xlu0 %342  ;;  %v371_v3 = vperm.slane %v349_v62, %v612_v1 }
  0x9d   :  { %v365_v4 = vperm.slane %v343_v61, %v297_v32  ;;  %v454_v32 = vld [vmem:[%s702_s5 + $0x8] sm:$0xff] }
  0x9e   :  { %v373_v12 = vsel %vm299_vm2, %v372_v5, %v371_v3  ;;  %477 = vmatpush.msra.mxu2 %v454_v32 }
  0x9f   :  { %v347_v8 = vpop.xlane.xlu2 %346  ;;  %v366_v11 = vsel %vm299_vm2, %v365_v4, %v364_v9 }
  0xa0   :  { %v369_v13 = vperm.slane %v347_v8, %v305_v40  ;;  %478 = vmatpush.msra.mxu2 %v453_v33 }
  0xa2   :  { %v330_v20 = vld [vmem:[#allocation2] sm:$0x3] }
  0xa3   :  { %v353_v6 = vpop.xlane.xlu1 %352 }
  0xa4   :  { %v345_v2 = vpop.xlane.xlu0 %344  ;;  %v374_v10 = vperm.slane %v353_v6, %v301_v34 }
  0xa5   :  { %v367_v7 = vperm.slane %v345_v2, %v301_v34  ;;  %v510_v34 = vld [vmem:[%s701_s4] ss:$0 sm:$0xff] }
  0xa6   :  { %v375_v17 = vsel %vm303_vm3, %v374_v10, %v373_v12 }
  0xa7   :  { %v368_v14 = vsel %vm303_vm3, %v367_v7, %v366_v11 }
  0xa8   :  { %v370_v18 = vsel %vm307_vm4, %v369_v13, %v368_v14 }
  0xac   :  { %v355_v15 = vpop.xlane.xlu0 %354 }
  0xad   :  { %v376_v16 = vperm.slane %v355_v15, %v305_v40 }
  0xaf   :  { %v377_v19 = vsel %vm307_vm4, %v376_v16, %v375_v17 }
  0xb0   :  { %v378_v21 = vsel %vm316_vm5, %v377_v19, %v370_v18 }
  0xb1   :  { %v380_v1 = vadd.f32 %v378_v21, %v330_v20 }
  0xb3   :  { %381 = vst.msk [vmem:[#allocation2] sm:$0x3] %vm47_vm1, %v380_v1 }
  0xba   :  { %v382_v22 = vld [vmem:[#allocation2] sm:$0x3] }
  0xbb   :  { %v383_v23 = vmul.f32 0.0014204546, %v382_v22 }
  0xbd   :  { %501 = vmatmul.msk.f32.vlgmr.msra.gmra.mxu0 %vm392_vm6, %v383_v23 }
 0x13a   :  { %v413_v28 = vpop.f32.mrf.mxu0 }
 0x13b   :  { %v414_v29 = vadd.f32 %v509_v27, %v413_v28 }
 0x13d   :  { %v417_v30 = vmul.f32 0.01, %v414_v29  ;;  %vm416_vm7 = vcmp.gt.f32.partialorder %v414_v29, 0.0 }
 0x13f   :  { %v418_v31 = vsel %vm416_vm7, %v414_v29, %v417_v30 }
 0x140   :  { %502 = vmatmul.msk.f32.vlgmr.msra.gmra.mxu1 %vm392_vm6, %v418_v31 }
 0x1bd   :  { %v447_v35 = vpop.f32.mrf.mxu1 }
 0x1be   :  { %v448_v36 = vadd.f32 %v510_v34, %v447_v35 }
 0x1c0   :  { %v451_v37 = vmul.f32 0.01, %v448_v36  ;;  %vm450_vm8 = vcmp.gt.f32.partialorder %v448_v36, 0.0 }
 0x1c2   :  { %v452_v38 = vsel %vm450_vm8, %v448_v36, %v451_v37 }
 0x1c3   :  { %503 = vmatmul.msk.f32.vlgmr.msra.gmra.mxu2 %vm459_vm9, %v452_v38 }
 0x246   :  { %v480_v40 = vpop.f32.mrf.mxu2 }
 0x247   :  { %v481_v41 = vadd.f32 %v511_v39, %v480_v40 }
 0x249   :  { %483 = vst [vmem:[#allocation6] sm:$0x3] %v481_v41 }
 0x24a   :  { %494 = dma.vmem_to_hbm [thread:$0]  %s490_s0, 32, %s492_s9, [#allocation5]  }
 0x24b   :  { %562 = dma.done.wait [#allocation5], 32  }
 0x24c   :  { %563 = vsyncadd [#allocation5], 4294967264 }
 0x24d   :  { %499 = vsyncpa [#allocation4], 1 }
 0x24e   :  { %500 = vsyncpa [#allocation5], 1 }

</bundles_post_ra>
